<compile_context>
chip_gen: v7x
topology: tpu7x:2x2x1
jax: 0.10.0
libtpu: 0.0.40
codegen_flags: <defaults>
</compile_context>

<pallas_src>
import jax
import jax.numpy as jnp
from jax.experimental import pallas as pl
from jax.experimental.pallas import tpu as pltpu

LANE = 128


def _round_up(n, m):
    return (n + m - 1) // m * m


def _linear_state_update_kernel(xT_ref, uT_ref, wA_ref, wB_ref, dxT_ref):
    """dx^T = A_w @ x^T + B_w @ u^T  (batch on the 128-lane axis)."""
    dx = jnp.dot(wA_ref[...], xT_ref[...], preferred_element_type=jnp.float32)
    dx = dx + jnp.dot(wB_ref[...], uT_ref[...], preferred_element_type=jnp.float32)
    dxT_ref[...] = dx.astype(dxT_ref.dtype)


def linear_state_update(x, u, params, *, batch_tile=512):
    """JAX/Pallas equivalent of LinearStateUpdate.forward.

    x: (B, n_x), u: (B, n_u); params: {"A": (n_x, n_x), "B": (n_x, n_u)} in
    PyTorch nn.Linear weight layout.  Returns dx: (B, n_x).
    """
    wA = params["A"].astype(jnp.float32)          # (n_x, n_x), used as-is
    wB = params["B"].astype(jnp.float32)          # (n_x, n_u), used as-is
    B, n_x = x.shape
    _, n_u = u.shape

    # Lane-dense layout: put batch on the 128-lane axis, zero-pad to the tile.
    bt = min(batch_tile, _round_up(B, LANE))
    b_pad = _round_up(B, bt)
    xT = jnp.zeros((n_x, b_pad), jnp.float32).at[:, :B].set(x.T.astype(jnp.float32))
    uT = jnp.zeros((n_u, b_pad), jnp.float32).at[:, :B].set(u.T.astype(jnp.float32))

    cost = pl.CostEstimate(
        flops=2 * b_pad * n_x * (n_x + n_u),
        transcendentals=0,
        bytes_accessed=4 * (2 * n_x * b_pad + n_u * b_pad + n_x * n_x + n_x * n_u),
    )

    dxT = pl.pallas_call(
        _linear_state_update_kernel,
        out_shape=jax.ShapeDtypeStruct((n_x, b_pad), jnp.float32),
        grid=(b_pad // bt,),
        in_specs=[
            pl.BlockSpec((n_x, bt), lambda i: (0, i)),    # x^T: tiled over batch
            pl.BlockSpec((n_u, bt), lambda i: (0, i)),    # u^T: tiled over batch
            pl.BlockSpec((n_x, n_x), lambda i: (0, 0)),   # A_w: resident in VMEM
            pl.BlockSpec((n_x, n_u), lambda i: (0, 0)),   # B_w: resident in VMEM
        ],
        out_specs=pl.BlockSpec((n_x, bt), lambda i: (0, i)),
        compiler_params=pltpu.CompilerParams(
            dimension_semantics=("parallel",),            # batch axis -> 2 TCs on v7x
        ),
        cost_estimate=cost,
    )(xT, uT, wA, wB)

    return dxT[:, :B].T                                   # back to (B, n_x)


def init_params(key, n_x, n_u, init_small=True):
    """Deterministic synthetic init matching the module's __init__ shapes."""
    kA, kB = jax.random.split(key, 2)
    std = 0.01 if init_small else 1.0
    return {
        "A": std * jax.random.normal(kA, (n_x, n_x), jnp.float32),
        "B": std * jax.random.normal(kB, (n_x, n_u), jnp.float32),
    }


def _reference(x, u, params):
    """Pure-JAX reference of the PyTorch forward (for correctness check)."""
    return x @ params["A"].T + u @ params["B"].T


if __name__ == "__main__":
    # Small shapes consistent with the module: n_x=4 states, n_u=2 inputs, batch=8.
    B, n_x, n_u = 8, 4, 2
    key = jax.random.PRNGKey(0)
    kx, ku, kp = jax.random.split(key, 3)

    x = jax.random.normal(kx, (B, n_x), jnp.float32)
    u = jax.random.normal(ku, (B, n_u), jnp.float32)
    params = init_params(kp, n_x, n_u, init_small=True)

    dx = linear_state_update(x, u, params)
    dx = jax.block_until_ready(dx)

    ref = _reference(x, u, params)
    assert dx.shape == (B, n_x)
    assert jnp.allclose(dx, ref, atol=1e-5, rtol=1e-5), "mismatch vs reference"

    print("KERNEL_OK")
</pallas_src>

<mosaic_0001>
module attributes {stable_mosaic.version = 11 : i64} {
  func.func @_linear_state_update_kernel(%arg0: i32, %arg1: memref<4x128xf32, #tpu.memory_space<vmem>>, %arg2: memref<2x128xf32, #tpu.memory_space<vmem>>, %arg3: memref<4x4xf32, #tpu.memory_space<vmem>>, %arg4: memref<4x2xf32, #tpu.memory_space<vmem>>, %arg5: memref<4x128xf32, #tpu.memory_space<vmem>>) attributes {dimension_semantics = [#tpu.dimension_semantics<parallel>], iteration_bounds = array<i64: 1>, scalar_prefetch = 0 : i64, scratch_operands = 0 : i64, tpu.core_type = #tpu.core_type<tc>, window_params = [{transform_indices = @transform_0, window_bounds = array<i64: 4, 128>}, {transform_indices = @transform_1, window_bounds = array<i64: 2, 128>}, {pipeline_mode = #tpu.pipeline_mode<synchronous>, transform_indices = @transform_2, window_bounds = array<i64: 4, 4>}, {pipeline_mode = #tpu.pipeline_mode<synchronous>, transform_indices = @transform_3, window_bounds = array<i64: 4, 2>}, {transform_indices = @transform_4, window_bounds = array<i64: 4, 128>}]} {
    %c0 = arith.constant 0 : index
    %c0_0 = arith.constant 0 : index
    %0 = vector.load %arg3[%c0, %c0_0] : memref<4x4xf32, #tpu.memory_space<vmem>>, vector<4x4xf32>
    %c0_1 = arith.constant 0 : index
    %c0_2 = arith.constant 0 : index
    %1 = vector.load %arg1[%c0_1, %c0_2] : memref<4x128xf32, #tpu.memory_space<vmem>>, vector<4x128xf32>
    %cst = arith.constant dense<0.000000e+00> : vector<4x128xf32>
    %2 = tpu.matmul %0, %1, %cst {dimension_numbers = #tpu.dot_dimension_numbers<[1], [0], [0], [1], [0, 0, 1, 1], [], []>} : vector<4x4xf32>, vector<4x128xf32>, vector<4x128xf32> -> vector<4x128xf32>
    %c0_3 = arith.constant 0 : index
    %c0_4 = arith.constant 0 : index
    %3 = vector.load %arg4[%c0_3, %c0_4] : memref<4x2xf32, #tpu.memory_space<vmem>>, vector<4x2xf32>
    %c0_5 = arith.constant 0 : index
    %c0_6 = arith.constant 0 : index
    %4 = vector.load %arg2[%c0_5, %c0_6] : memref<2x128xf32, #tpu.memory_space<vmem>>, vector<2x128xf32>
    %cst_7 = arith.constant dense<0.000000e+00> : vector<4x128xf32>
    %5 = tpu.matmul %3, %4, %cst_7 {dimension_numbers = #tpu.dot_dimension_numbers<[1], [0], [0], [1], [0, 0, 1, 1], [], []>} : vector<4x2xf32>, vector<2x128xf32>, vector<4x128xf32> -> vector<4x128xf32>
    %6 = arith.addf %2, %5 : vector<4x128xf32>
    %c0_8 = arith.constant 0 : index
    %c0_9 = arith.constant 0 : index
    %7 = vector.load %arg5[%c0_8, %c0_9] : memref<4x128xf32, #tpu.memory_space<vmem>>, vector<4x128xf32>
    tpu.vector_store %arg5[%c0_8, %c0_9], %6 {strides = array<i32>} : memref<4x128xf32, #tpu.memory_space<vmem>>, vector<4x128xf32>,
    return
  }
  func.func @transform_0(%arg0: i32) -> (i32, i32) {
    %c0_i32 = arith.constant 0 : i32
    %c0_i32_0 = arith.constant 0 : i32
    return %c0_i32, %arg0 : i32, i32
  }
  func.func @transform_1(%arg0: i32) -> (i32, i32) {
    %c0_i32 = arith.constant 0 : i32
    %c0_i32_0 = arith.constant 0 : i32
    return %c0_i32, %arg0 : i32, i32
  }
  func.func @transform_2(%arg0: i32) -> (i32, i32) {
    %c0_i32 = arith.constant 0 : i32
    %c0_i32_0 = arith.constant 0 : i32
    %c0_i32_1 = arith.constant 0 : i32
    return %c0_i32, %c0_i32_0 : i32, i32
  }
  func.func @transform_3(%arg0: i32) -> (i32, i32) {
    %c0_i32 = arith.constant 0 : i32
    %c0_i32_0 = arith.constant 0 : i32
    %c0_i32_1 = arith.constant 0 : i32
    return %c0_i32, %c0_i32_0 : i32, i32
  }
  func.func @transform_4(%arg0: i32) -> (i32, i32) {
    %c0_i32 = arith.constant 0 : i32
    %c0_i32_0 = arith.constant 0 : i32
    return %c0_i32, %arg0 : i32, i32
  }
}

</mosaic_0001>

<bundles_post_ra>
// kernel: tpu_custom_call.1
= control target key start
LH: loop header
LB: loop body
LE: loop exit
PB: predicated region body
PF: predicated region fallthrough
CT: control target
= control target key end

     0   :  { %9 = vsyncpa [#allocation3], 0  ;;  %s339_s0 = inlined_call_operand.vmem [shape: f32[4,128], index: 0, kind: input, shape index: {}]   ;;  %s340_s1 = inlined_call_operand.hbm [shape: f32[2,128], index: 1, kind: input, shape index: {}]   ;;  %s341_s2 = inlined_call_operand.vmem [shape: f32[4,4], index: 2, kind: input, shape index: {}]   ;;  %s342_s3 = inlined_call_operand.vmem [shape: f32[4,2], index: 3, kind: input, shape index: {}]   ;;  %s343_s4 = inlined_call_operand.hbm [shape: f32[4,128], index: 4, kind: output, shape index: {}]  }
   0x1   :  { %10 = vsyncpa [#allocation4], 0  ;;  %s277_s15 = smov [#allocation2]   ;;  %s229_s19 = scalar_lea.hbm %s340_s1, 32 }
   0x2   :  { %s19_s16 = sshll.u32 %s277_s15, 4  ;;  %p230_p0 = scmp.ne.s32.totalorder %s340_s1, %s229_s19  ;;  %s20_s16 = int_to_ptr.vmem [resolvable:$true] %s19_s16 }
   0x3   :  { %p233_p1 = scmp.lt.u32.totalorder %s229_s19, %s340_s1 }
   0x5   :  { %p235_p2 = pnand %p233_p1, %p230_p0 }
   0x7   :  { %238 = shalt.err (!%p235_p2)
}
   0x8   :  { %s239_s24 = scalar_lea.vmem %s20_s16, 32  ;;  %p244_p4 = scmp.lt.s32.totalorder %s20_s16, %s20_s16 }
   0x9   :  { %p240_p3 = scmp.ne.s32.totalorder %s20_s16, %s239_s24  ;;  %p245_p5 = scmp.lt.s32.totalorder %s239_s24, %s239_s24 }
   0xb   :  { %p246_p6 = por %p245_p5, %p244_p4 }
   0xd   :  { %p247_p7 = pnand %p246_p6, %p240_p3 }
   0xf   :  { %250 = shalt.err (!%p247_p7)
}
  0x10   :  { %22 = dma.hbm_to_vmem [thread:$0]  %s340_s1, 32, %s20_s16, [#allocation3]  }
  0x11   :  { %273 = dma.done.wait [#allocation3], 32  }
  0x12   :  { %274 = vsyncadd [#allocation3], 4294967264  ;;  %v278_v0 = vmov 0.0   ;;  %vm279_vm0 = vmmov 0   ;;  %vm38_vm1 = vcmask 1041408   ;;  %vm116_vm2 = vcmask 1043456  }
  0x13   :  { %214 = vmatprep.subr.mxu1 %v278_v0  ;;  %219 = vmatprep.subr.mxu0 %v278_v0  ;;  %vm34_vm3 = vcmask 15360   ;;  %vm112_vm4 = vcmask 31744   ;;  %v33_v1 = vld [vmem:[#allocation2] sm:$0x3]  ;;  %s280_s6 = smov [#allocation5]  }
  0x14   :  { %216 = vmatprep.mubr.msk.f32.mxu1 %vm279_vm0, %v278_v0  ;;  %221 = vmatprep.mubr.msk.f32.mxu0 %vm279_vm0, %v278_v0  ;;  %v31_v2 = vld [vmem:[%s339_s0] sm:$0xf]  ;;  %s197_s7 = sshll.u32 %s280_s6, 4  ;;  %s198_s7 = int_to_ptr.vmem [resolvable:$true] %s197_s7 }
  0x15   :  { %v32_v3 = vld [vmem:[%s342_s3] sm:$0xf]  ;;  %215 = vmatpush3.msk.msra.mxu1 %vm38_vm1, %v33_v1  ;;  %220 = vmatpush3.msk.msra.mxu0 %vm116_vm2, %v31_v2  ;;  %s251_s0 = scalar_lea.vmem %s198_s7, 64  ;;  %p256_p9 = scmp.lt.s32.totalorder %s198_s7, %s198_s7 }
  0x16   :  { %v30_v4 = vld [vmem:[%s341_s2] sm:$0xf]  ;;  %217 = vmatmul.mubr.msk.f32.vlgmr.msra.gmra.mrb[0].mxu1 %vm34_vm3, %v32_v3  ;;  %p252_p8 = scmp.ne.s32.totalorder %s198_s7, %s251_s0  ;;  %p257_p10 = scmp.lt.s32.totalorder %s251_s0, %s251_s0 }
  0x17   :  { %222 = vmatmul.mubr.msk.f32.vlgmr.msra.gmra.mrb[0].mxu0 %vm112_vm4, %v30_v4 }
  0x18   :  { %p258_p11 = por %p257_p10, %p256_p9 }
  0x1a   :  { %p259_p12 = pnand %p258_p11, %p252_p8 }
  0xe9   :  { %v108_v5 = vpop.f32.mrb[0].mxu1 }
  0xea   :  { %v186_v6 = vpop.f32.mrb[0].mxu0  ;;  %v218_v8 = vpop.f32.mrb[1].mxu1 }
  0xeb   :  { %v187_v7 = vadd.f32 %v186_v6, %v108_v5  ;;  %v223_v9 = vpop.f32.mrb[1].mxu0 }
  0xed   :  { %190 = vst [vmem:[#allocation5] sm:$0xf] %v187_v7 }
  0xee   :  { %262 = shalt.err (!%p259_p12)
}
  0xef   :  { %s263_s8 = scalar_lea.hbm %s343_s4, 64 }
  0xf0   :  { %p264_p13 = scmp.ne.s32.totalorder %s343_s4, %s263_s8  ;;  %p267_p0 = scmp.lt.u32.totalorder %s263_s8, %s343_s4 }
  0xf2   :  { %p269_p1 = pnand %p267_p0, %p264_p13 }
  0xf4   :  { %272 = shalt.err (!%p269_p1)
}
  0xf5   :  { %200 = dma.vmem_to_hbm [thread:$0]  %s198_s7, 64, %s343_s4, [#allocation4]  }
  0xf6   :  { %275 = dma.done.wait [#allocation4], 64  }
  0xf7   :  { %276 = vsyncadd [#allocation4], 4294967232 }
  0xf8   :  { %204 = vsyncpa [#allocation3], 1 }
  0xf9   :  { %205 = vsyncpa [#allocation4], 1 }

</bundles_post_ra>
